<compile_context>
chip_gen: v6e
topology: v6e:2x2x1
jax: 0.10.0
libtpu: 0.0.40
codegen_flags: <defaults>
</compile_context>

<pallas_src>
import functools

import numpy as np
import jax
import jax.numpy as jnp
from jax.experimental import pallas as pl
from jax.experimental.pallas import tpu as pltpu

EPS = 1e-6

_ROW_TILES = (512, 256, 128, 64, 32, 16)        # multiples of 16 (bf16 pack)
_ROW_TILES_BIG = (2048, 1024) + _ROW_TILES      # fallback: amortize table re-reads
_K_TILES = (1024, 512, 256, 128)                # multiples of 128 (lane dim)


def _physical_vmem_bytes():
    """Per-TensorCore VMEM capacity; conservative 64 MiB (v7x) if unknown."""
    try:
        info = pltpu.get_tpu_info()
        for attr in ("vmem_capacity_bytes", "vmem_size_bytes", "vmem_bytes"):
            val = getattr(info, attr, None)
            if val:
                return int(val)
    except Exception:
        pass
    return 64 * 1024 * 1024


def _compiler_params(sem, need_bytes, limit_cap):
    kwargs = dict(dimension_semantics=sem)
    # v5e's default scoped-VMEM limit is only 16 MiB; raise it whenever the
    # footprint is non-trivial, but never above ~7/8 of physical VMEM.
    if need_bytes > 12 * 1024 * 1024:
        kwargs["vmem_limit_bytes"] = int(min(need_bytes + (4 << 20), limit_cap))
    return pltpu.CompilerParams(**kwargs)


def _resident_bytes(tm, k, d, f_bytes, e_bytes, out_bytes):
    # Double-buffered features tile + embeddings table (the pipeline still
    # allocates two buffers even though the constant block index means it is
    # only fetched once) + double-buffered output tile.
    return 2 * tm * k * f_bytes + 2 * k * d * e_bytes + 2 * tm * d * out_bytes


def _pick_resident_tm(n, k, d, f_bytes, e_bytes, out_bytes, budget):
    # Prefer big row tiles, but keep >=4 tiles when possible so each v7x
    # TensorCore gets >=2 pipelined grid steps (overlap DMA with compute).
    for min_tiles in (4, 2, 1):
        for tm in _ROW_TILES:
            if (
                pl.cdiv(n, tm) >= min_tiles
                and _resident_bytes(tm, k, d, f_bytes, e_bytes, out_bytes) <= budget
            ):
                return tm
    return 16


def _resident_kernel(compute_dtype, f_ref, e_ref, o_ref):
    # Single MXU matmul over full K per row tile; the cast to the MXU dtype
    # runs on the VPU and is hidden under the features DMA.
    y = jnp.dot(
        f_ref[...].astype(compute_dtype),
        e_ref[...].astype(compute_dtype),
        preferred_element_type=jnp.float32,
    )
    sumsq = jnp.sum(y * y, axis=-1, keepdims=True)
    inv_norm = jax.lax.rsqrt(jnp.maximum(sumsq, EPS * EPS))  # EUP, no divide
    o_ref[...] = (y * inv_norm).astype(o_ref.dtype)


def _ktiled_kernel(compute_dtype, f_ref, e_ref, o_ref, acc_ref):
    # Fallback when the K x D table does not fit in VMEM: reduce over the K
    # grid axis into an f32 scratch accumulator, normalize on the last step.
    k = pl.program_id(1)

    @pl.when(k == 0)
    def _():
        acc_ref[...] = jnp.zeros_like(acc_ref)

    acc_ref[...] += jnp.dot(
        f_ref[...].astype(compute_dtype),
        e_ref[...].astype(compute_dtype),
        preferred_element_type=jnp.float32,
    )

    @pl.when(k == pl.num_programs(1) - 1)
    def _():
        y = acc_ref[...]
        sumsq = jnp.sum(y * y, axis=-1, keepdims=True)
        o_ref[...] = (y * jax.lax.rsqrt(jnp.maximum(sumsq, EPS * EPS))).astype(
            o_ref.dtype
        )


def vertex_feature_embedder_forward(
    features, embeddings, *, compute_dtype=jnp.bfloat16, out_dtype=jnp.float32
):
    """features: [N, K], embeddings: [K, D] -> L2-normalized [N, D]."""
    N, K = features.shape
    K2, D = embeddings.shape
    assert K == K2, (K, K2)

    f_bytes = np.dtype(features.dtype).itemsize
    e_bytes = np.dtype(embeddings.dtype).itemsize
    out_bytes = np.dtype(out_dtype).itemsize
    cd_bytes = np.dtype(compute_dtype).itemsize

    phys = _physical_vmem_bytes()
    limit_cap = min((phys * 7) // 8, 100 << 20)  # <=56 MiB v7x, <=100 MiB v5e/v6e
    budget = limit_cap - (4 << 20)               # headroom for compiler scratch

    f = features
    e = embeddings

    # ---------------- Resident-embeddings fast path --------------------------
    def min_resident(eb):
        return _resident_bytes(16, K, D, f_bytes, eb, out_bytes)

    use_resident = min_resident(e_bytes) <= budget
    if not use_resident and cd_bytes < e_bytes and min_resident(cd_bytes) <= budget:
        # Table too big in its stored dtype but fits at the compute dtype: a
        # one-time wrapper cast of the grid-invariant table is far cheaper
        # than re-streaming it from HBM once per row tile in the fallback.
        e = embeddings.astype(compute_dtype)
        e_bytes = cd_bytes
        use_resident = True

    if use_resident:
        tm = _pick_resident_tm(N, K, D, f_bytes, e_bytes, out_bytes, budget)
        n_pad = pl.cdiv(N, tm) * tm
        if n_pad != N:
            # Zero rows normalize to zero and are sliced off below.
            f = jnp.pad(f, ((0, n_pad - N), (0, 0)))

        need = _resident_bytes(tm, K, D, f_bytes, e_bytes, out_bytes)
        cost = pl.CostEstimate(
            flops=2 * n_pad * K * D,
            transcendentals=0,
            bytes_accessed=n_pad * K * f_bytes
            + K * D * e_bytes
            + n_pad * D * out_bytes,
        )
        out = pl.pallas_call(
            functools.partial(_resident_kernel, compute_dtype),
            out_shape=jax.ShapeDtypeStruct((n_pad, D), out_dtype),
            grid_spec=pltpu.PrefetchScalarGridSpec(
                num_scalar_prefetch=0,
                grid=(n_pad // tm,),
                in_specs=[
                    pl.BlockSpec((tm, K), lambda i: (i, 0)),  # features row tile
                    pl.BlockSpec((K, D), lambda i: (0, 0)),   # embeddings, resident
                ],
                out_specs=pl.BlockSpec((tm, D), lambda i: (i, 0)),
            ),
            compiler_params=_compiler_params(("parallel",), need, limit_cap),
            cost_estimate=cost,
        )(f, e)
        return out[:N] if n_pad != N else out

    # ---------------- Fallback: K-tiled reduction (huge tables) --------------
    if cd_bytes < e_bytes:
        # The table is re-streamed from HBM once per row tile here; a single
        # cast pass to the compute dtype halves that recurring traffic.
        e = embeddings.astype(compute_dtype)
        e_bytes = cd_bytes

    # tk is the lane dim of the features block: multiple of 128 (zero-pad K if
    # needed; zero padding does not change the matmul result).
    k_pad = pl.cdiv(K, 128) * 128
    tk = 128
    for cand in _K_TILES:
        if k_pad % cand == 0:
            tk = cand
            break

    def tiled_bytes(tm):
        return (
            2 * tm * tk * f_bytes
            + 2 * tk * D * e_bytes
            + 2 * tm * D * out_bytes
            + tm * D * 4  # f32 accumulator scratch
        )

    tm = 16
    for cand in _ROW_TILES_BIG:  # big tm amortizes full-table HBM re-reads
        if tiled_bytes(cand) <= budget:
            tm = cand
            break

    n_pad = pl.cdiv(N, tm) * tm
    if n_pad != N or k_pad != K:
        f = jnp.pad(f, ((0, n_pad - N), (0, k_pad - K)))
    if k_pad != K:
        e = jnp.pad(e, ((0, k_pad - K), (0, 0)))

    need = tiled_bytes(tm)
    cost = pl.CostEstimate(
        flops=2 * n_pad * k_pad * D,
        transcendentals=0,
        bytes_accessed=n_pad * k_pad * f_bytes
        + (n_pad // tm) * k_pad * D * e_bytes  # table re-read per row tile
        + n_pad * D * out_bytes,
    )
    out = pl.pallas_call(
        functools.partial(_ktiled_kernel, compute_dtype),
        out_shape=jax.ShapeDtypeStruct((n_pad, D), out_dtype),
        grid_spec=pltpu.PrefetchScalarGridSpec(
            num_scalar_prefetch=0,
            grid=(n_pad // tm, k_pad // tk),
            in_specs=[
                pl.BlockSpec((tm, tk), lambda i, k: (i, k)),
                pl.BlockSpec((tk, D), lambda i, k: (k, 0)),
            ],
            out_specs=pl.BlockSpec((tm, D), lambda i, k: (i, 0)),
            scratch_shapes=[pltpu.VMEM((tm, D), jnp.float32)],
        ),
        compiler_params=_compiler_params(("parallel", "arbitrary"), need, limit_cap),
        cost_estimate=cost,
    )(f, e)
    return out[:N] if n_pad != N else out


if __name__ == "__main__":
    # Module shapes: num_vertices=N, feature_dim=K, embed_dim=D (kept small).
    N, K, D = 256, 256, 128

    # reset_parameters() zeros both tensors in PyTorch (degenerate for a
    # numerical check); use deterministic PRNGKey(0) values instead, as if
    # loaded via .load().
    key = jax.random.PRNGKey(0)
    kf, ke = jax.random.split(key)
    features = jax.random.normal(kf, (N, K), dtype=jnp.float32)
    embeddings = jax.random.normal(ke, (K, D), dtype=jnp.float32) * 0.05

    out = vertex_feature_embedder_forward(features, embeddings)
    out = jax.block_until_ready(out)
    assert out.shape == (N, D)
    assert out.dtype == jnp.float32

    # Reference with matching bf16 matmul inputs / f32 accumulation.
    y = jnp.dot(
        features.astype(jnp.bfloat16),
        embeddings.astype(jnp.bfloat16),
        preferred_element_type=jnp.float32,
    )
    ref = y * jax.lax.rsqrt(
        jnp.maximum(jnp.sum(y * y, axis=-1, keepdims=True), EPS * EPS)
    )
    assert jnp.allclose(out, ref, atol=2e-3, rtol=2e-3), float(
        jnp.max(jnp.abs(out - ref))
    )

    # Loose sanity check against the full-f32 reference (bf16 compute rounding).
    y32 = features @ embeddings
    ref32 = y32 / jnp.maximum(
        jnp.sqrt(jnp.sum(y32 * y32, axis=-1, keepdims=True)), EPS
    )
    assert jnp.allclose(out, ref32, atol=3e-2, rtol=3e-2)

    print("KERNEL_OK")
</pallas_src>

<mosaic_0001>
module attributes {stable_mosaic.version = 11 : i64} {
  func.func @_resident_kernel(%arg0: i32, %arg1: memref<64x256xf32, #tpu.memory_space<vmem>>, %arg2: memref<256x128xf32, #tpu.memory_space<vmem>>, %arg3: memref<64x128xf32, #tpu.memory_space<vmem>>) attributes {dimension_semantics = [#tpu.dimension_semantics<parallel>], iteration_bounds = array<i64: 4>, scalar_prefetch = 0 : i64, scratch_operands = 0 : i64, tpu.core_type = #tpu.core_type<tc>, window_params = [{transform_indices = @transform_0, window_bounds = array<i64: 64, 256>}, {pipeline_mode = #tpu.pipeline_mode<synchronous>, transform_indices = @transform_1, window_bounds = array<i64: 256, 128>}, {transform_indices = @transform_2, window_bounds = array<i64: 64, 128>}]} {
    %c0 = arith.constant 0 : index
    %c0_0 = arith.constant 0 : index
    %0 = vector.load %arg1[%c0, %c0_0] : memref<64x256xf32, #tpu.memory_space<vmem>>, vector<64x256xf32>
    %1 = arith.truncf %0 : vector<64x256xf32> to vector<64x256xbf16>
    %c0_1 = arith.constant 0 : index
    %c0_2 = arith.constant 0 : index
    %2 = vector.load %arg2[%c0_1, %c0_2] : memref<256x128xf32, #tpu.memory_space<vmem>>, vector<256x128xf32>
    %3 = arith.truncf %2 : vector<256x128xf32> to vector<256x128xbf16>
    %cst = arith.constant dense<0.000000e+00> : vector<64x128xf32>
    %4 = tpu.matmul %1, %3, %cst {dimension_numbers = #tpu.dot_dimension_numbers<[1], [0], [0], [1], [0, 0, 1, 1], [], []>} : vector<64x256xbf16>, vector<256x128xbf16>, vector<64x128xf32> -> vector<64x128xf32>
    %5 = arith.mulf %4, %4 : vector<64x128xf32>
    %cst_3 = arith.constant dense<0.000000e+00> : vector<64xf32>
    %6 = vector.multi_reduction <add>, %5, %cst_3 [1] : vector<64x128xf32> to vector<64xf32>
    %7 = vector.shape_cast %6 : vector<64xf32> to vector<64x1xf32>
    %cst_4 = arith.constant 9.99999996E-13 : f32
    %8 = vector.broadcast %cst_4 : f32 to vector<64x1xf32>
    %9 = arith.maximumf %7, %8 : vector<64x1xf32>
    %10 = math.rsqrt %9 : vector<64x1xf32>
    %11 = vector.broadcast %10 : vector<64x1xf32> to vector<64x128xf32>
    %12 = arith.mulf %4, %11 : vector<64x128xf32>
    %c0_5 = arith.constant 0 : index
    %c0_6 = arith.constant 0 : index
    %13 = vector.load %arg3[%c0_5, %c0_6] : memref<64x128xf32, #tpu.memory_space<vmem>>, vector<64x128xf32>
    tpu.vector_store %arg3[%c0_5, %c0_6], %12 {strides = array<i32>} : memref<64x128xf32, #tpu.memory_space<vmem>>, vector<64x128xf32>,
    return
  }
  func.func @transform_0(%arg0: i32) -> (i32, i32) {
    %c0_i32 = arith.constant 0 : i32
    %c0_i32_0 = arith.constant 0 : i32
    return %arg0, %c0_i32 : i32, i32
  }
  func.func @transform_1(%arg0: i32) -> (i32, i32) {
    %c0_i32 = arith.constant 0 : i32
    %c0_i32_0 = arith.constant 0 : i32
    %c0_i32_1 = arith.constant 0 : i32
    return %c0_i32, %c0_i32_0 : i32, i32
  }
  func.func @transform_2(%arg0: i32) -> (i32, i32) {
    %c0_i32 = arith.constant 0 : i32
    %c0_i32_0 = arith.constant 0 : i32
    return %arg0, %c0_i32 : i32, i32
  }
}

</mosaic_0001>

<bundles_post_ra>
// kernel: tpu_custom_call.1
= control target key start
LH: loop header
LB: loop body
LE: loop exit
PB: predicated region body
PF: predicated region fallthrough
CT: control target
= control target key end

     0   :  { %7 = vsyncpa [#allocation3], 0  ;;  %s978_s0 = inlined_call_operand.hbm [shape: f32[256,256], index: 0, kind: input, shape index: {}]   ;;  %s979_s1 = inlined_call_operand.hbm [shape: f32[256,128], index: 1, kind: input, shape index: {}]   ;;  %s980_s2 = inlined_call_operand.hbm [shape: f32[256,128], index: 2, kind: output, shape index: {}]  }
   0x1   :  { %9 = vsyncpa [#allocation3 + $0x1], 0 }
   0x2   :  { %10 = vsyncpa [#allocation6], 0 }
   0x3   :  { %11 = vsyncpa [#allocation4], 0 }
   0x4   :  { %13 = vsyncpa [#allocation4 + $0x1], 0  ;;  %s774_s9 = smov 0   ;;  %s776_s10 = smov 0  }
   0x5   :  { %s778_s11 = smov 0   ;;  %s780_s12 = smov 0  }
   0x6 LB: > { %s795_s13 = sadd.s32 4294967295, %s748_s12   ;;  %s471_s14 = sadd.s32 4294967294, %s748_s12   ;;  %s748_s12 = sphi %s780_s12, %s1001_s12   ;;  %s744_s11 = sphi %s778_s11, %s1000_s11   ;;  %s740_s10 = sphi %s776_s10, %s999_s10   ;;  %s736_s9 = sphi %s774_s9, %s998_s9  }
   0x7   : > { %p39_p0 = scmp.ne.s32.totalorder %s740_s10, %s736_s9  ;;  %p981_p1 = scmp.eq.s32.totalorder %s795_s13, 0 }
   0x8   : > { %p90_p3 = scmp.eq.s32.totalorder %s471_s14, 3  ;;  %p472_p5 = scmp.ge.s32.totalorder %s748_s12, 1 }
   0x9   : > { %p804_p4 = por %p981_p1, %p39_p0  ;;  %p97_p7 = scmp.lt.s32.totalorder %s748_s12, 5 }
   0xa   : > { %p809_p6 = por %p90_p3, %p39_p0  ;;  %s750_s18 = smov [#allocation5]  }
   0xb   : > { %s985_s15 = scalar_select %p804_p4, 1, 0 }
   0xc   : > { %s986_s16 = scalar_select %p809_p6, 1, 0 }
   0xd   : > { %p814_p8 = pnand %p472_p5, %p97_p7  ;;  %s109_s19 = sshll.u32 %s750_s18, 4  ;;  %s110_s19 = int_to_ptr.vmem [resolvable:$true] %s109_s19 }
   0xe   : > { %s827_s21 = sadd.s32 1, %s748_s12   ;;  %s26_s22 = sadd.s32 1, %s744_s11 }
   0xf   : > { %s987_s17 = scalar_select %p814_p8, 1, 0 }
  0x10   : > { %p555_p9 = pneg %p814_p8  ;;  %s23_s23 = ssub.s32 %s748_s12, %s827_s21 }
  0x11   : > { %s637_s24 = scalar_lea.vmem %s110_s19, 4096  ;;  %p645_p3 = scmp.lt.s32.totalorder %s110_s19, %s110_s19 }
  0x12   : > { %p822_p10 = pnand %p555_p9, %p981_p1  ;;  %p638_p12 = scmp.ne.s32.totalorder %s110_s19, %s637_s24 }
  0x13   : > { %p646_p5 = scmp.lt.s32.totalorder %s637_s24, %s637_s24 }
  0x14   : > { %p628_p11 = pneg %p822_p10 }
  0x15   : > { %p647_p7 = por %p646_p5, %p645_p3 }
  0x16   : > { %p640_p13 = pnand %p638_p12, %p628_p11 }
  0x18   : > { %p641_p0 = pneg %p640_p13 }
  0x1a   : > { %p648_p2 = pnand %p647_p7, %p641_p0 }
  0x1c   : > { %651 = shalt.err (!%p648_p2)
}
  0x1d   : > { %s751_s25 = smov 128   ;;  %s752_s26 = smov 8  }
  0x1e   : > { %558 = dma.hbm_to_vmem [thread:$0]  (!%p822_p10), %s979_s1, 4096, %s110_s19, [#allocation6], %s751_s25, %s751_s25, %s752_s26  }
  0x1f   : > { %p24_p9 = scmp.eq.s32.totalorder %s23_s23, 0  ;;  %p33_p11 = scmp.ne.s32.totalorder %s744_s11, %s740_s10 }
  0x20   : > { %p34_p12 = scmp.eq.s32.totalorder %s748_s12, 0  ;;  %p568_p2 = scmp.lt.s32.totalorder %s748_s12, 4 }
  0x21   : > { %s844_s29 = scalar_select %p24_p9, %s744_s11, %s26_s22  }
  0x22   : > { %p35_p13 = por %p34_p12, %p33_p11  ;;  %p989_p0 = scmp.eq.s32.totalorder %s795_s13, 3 }
  0x23   : > { %s123_s3 = sand.u32 1, %s744_s11   ;;  %s489_s4 = sshll.u32 %s748_s12, 11 }
  0x24   : > { %p848_p3 = por %p989_p0, %p33_p11  ;;  %s475_s5 = sshll.u32 %s123_s3, 7 }
  0x25   : > { %s857_s8 = scalar_lea.hbm %s978_s0, %s489_s4  ;;  %s127_s14 = scalar_lea.vmem [#allocation2], %s475_s5 }
  0x26   : > { %s990_s30 = scalar_select %p848_p3, 1, 0 }
  0x27   : > { %s135_s18 = sshll.u32 %s127_s14, 4  ;;  %p859_p10 = pnand %p568_p2, %p35_p13  ;;  %s863_s18 = int_to_ptr.vmem [resolvable:$true] %s135_s18 }
  0x28   : > { %s865_s20 = scalar_lea.sflag [#allocation3], %s123_s3  ;;  %s652_s22 = scalar_lea.hbm %s857_s8, 2048 }
  0x29   : > { %p653_p5 = scmp.ne.s32.totalorder %s857_s8, %s652_s22  ;;  %p654_p7 = pneg %p859_p10 }
  0x2a   : > { %s657_s25 = scalar_lea.hbm %s978_s0, 8192  ;;  %p658_p12 = scmp.lt.s32.totalorder %s857_s8, %s978_s0 }
  0x2b   : > { %p655_p9 = pnand %p654_p7, %p653_p5  ;;  %p659_p2 = scmp.lt.s32.totalorder %s657_s25, %s652_s22 }
  0x2d   : > { %p656_p11 = pneg %p655_p9  ;;  %p660_p13 = por %p659_p2, %p658_p12 }
  0x2f   : > { %p661_p0 = pnand %p660_p13, %p656_p11 }
  0x31   : > { %664 = shalt.err (!%p661_p0)
}
  0x32   : > { %s665_s28 = scalar_lea.vmem %s863_s18, 2048  ;;  %s753_s3 = smov [#allocation2]  }
  0x33   : > { %p666_p1 = scmp.ne.s32.totalorder %s863_s18, %s665_s28  ;;  %s670_s4 = sshll.u32 %s753_s3, 4  ;;  %s671_s4 = int_to_ptr.vmem [resolvable:$false] %s670_s4 }
  0x34   : > { %s672_s5 = scalar_lea.vmem %s671_s4, 4096  ;;  %p673_p9 = scmp.lt.s32.totalorder %s863_s18, %s671_s4 }
  0x35   : > { %p668_p6 = pnand %p666_p1, %p654_p7  ;;  %p674_p3 = scmp.lt.s32.totalorder %s672_s5, %s665_s28 }
  0x37   : > { %p669_p5 = pneg %p668_p6  ;;  %p675_p4 = por %p674_p3, %p673_p9 }
  0x39   : > { %p676_p8 = pnand %p675_p4, %p669_p5 }
  0x3b   : > { %679 = shalt.err (!%p676_p8)
}
  0x3c   : > { %s754_s6 = smov 256   ;;  %s755_s7 = smov 16  }
  0x3d   : > { %562 = dma.hbm_to_vmem [thread:$0]  (!%p859_p10), %s857_s8, 2048, %s863_s18, %s865_s20, %s754_s6, %s754_s6, %s755_s7  }
  0x3e   : > { %p992_p1 = scmp.ne.s32.totalorder %s987_s17, 0 }
  0x3f   : > { %s889_s14 = sand.u32 (!%p992_p1), 1, %s740_s10   ;;  %p993_p4 = scmp.ne.s32.totalorder (!%p992_p1), %s985_s15, 0 }
  0x40   : > { %147 = sbr.rel (%p992_p1) target bundleno = 493 (0x1ed), region = 28  ;;  %s480_s22 = sshll.u32 (!%p992_p1), %s889_s14, 7 }
  0x41   : > { %s150_s23 = scalar_lea.sflag (!%p992_p1), [#allocation3], %s889_s14  ;;  %s893_s24 = scalar_lea.vmem (!%p992_p1), [#allocation2], %s480_s22 }
  0x45   : > { %723 = dma.done.wait (%p993_p4), %s150_s23, 2048  }
  0x46   : > { %725 = vsyncadd (%p993_p4), %s150_s23, 4294965248  ;;  %p994_p6 = scmp.eq.s32.totalorder %s795_s13, 0 }
  0x48   : > { %727 = dma.done.wait (%p994_p6), [#allocation6], 4096   ;;  %p995_p8 = pmov %p994_p6 }
  0x49   : > { %v235_v0 = vld [vmem:[#allocation5 + $0xf0] sm:$0xff]  ;;  %v236_v1 = vld [vmem:[#allocation5 + $0xf8] sm:$0xff]  ;;  %v233_v5 = vld [vmem:[#allocation5 + $0xe0] sm:$0xff]  ;;  %s482_s15 = sshll.u32 %s889_s14, 6  ;;  %s490_s8 = sshll.u32 %s795_s13, 10 }
  0x4a   : > { %729 = vsyncadd (%p995_p8), [#allocation6], 4294963200  ;;  %v219_v2 = vld [vmem:[#allocation5 + $0x70] sm:$0xff]  ;;  %v252_v3 = vpack.c.bf16 %v236_v1, %v235_v0  ;;  %v220_v4 = vld [vmem:[#allocation5 + $0x78] sm:$0xff]  ;;  %s177_s17 = scalar_lea.vmem [#allocation7], %s482_s15  ;;  %s934_s25 = scalar_lea.hbm %s980_s2, %s490_s8 }
  0x4b   : > { %v234_v6 = vld [vmem:[#allocation5 + $0xe8] sm:$0xff]  ;;  %v244_v7 = vpack.c.bf16 %v220_v4, %v219_v2  ;;  %v217_v9 = vld [vmem:[#allocation5 + $0x60] sm:$0xff]  ;;  %v231_v11 = vld [vmem:[#allocation5 + $0xd0] sm:$0xff]  ;;  %s388_s18 = sshll.u32 %s177_s17, 4  ;;  %s375_s26 = scalar_lea.sflag [#allocation4], %s889_s14  ;;  %s936_s18 = int_to_ptr.vmem [resolvable:$true] %s388_s18 }
  0x4c   : > { %v251_v8 = vpack.c.bf16 %v234_v6, %v233_v5  ;;  %v218_v10 = vld [vmem:[#allocation5 + $0x68] sm:$0xff]  ;;  %491 = vmatprep.subr.bf16.mxu0 %v252_v3  ;;  %531 = vmatprep.subr.bf16.mxu1 %v252_v3  ;;  %v232_v12 = vld [vmem:[#allocation5 + $0xd8] sm:$0xff]  ;;  %v215_v15 = vld [vmem:[#allocation5 + $0x50] sm:$0xff]  ;;  %s680_s27 = scalar_lea.vmem %s936_s18, 1024  ;;  %p996_p10 = scmp.ne.s32.totalorder %s990_s30, 0 }
  0x4d   : > { %492 = vmatpush3.bf16.msra.mxu0 %v244_v7  ;;  %539 = vmatpush3.bf16.msra.mxu1 %v244_v7  ;;  %v243_v13 = vpack.c.bf16 %v218_v10, %v217_v9  ;;  %v250_v14 = vpack.c.bf16 %v232_v12, %v231_v11  ;;  %v216_v16 = vld [vmem:[#allocation5 + $0x58] sm:$0xff]  ;;  %v229_v17 = vld [vmem:[#allocation5 + $0xc0] sm:$0xff]  ;;  %v230_v18 = vld [vmem:[#allocation5 + $0xc8] sm:$0xff]  ;;  %p681_p3 = scmp.ne.s32.totalorder %s936_s18, %s680_s27  ;;  %s756_s13 = smov [#allocation7]  }
  0x4e   : > { %493 = vmatprep.subr.bf16.mxu0 %v251_v8  ;;  %532 = vmatprep.subr.bf16.mxu1 %v251_v8  ;;  %v242_v19 = vpack.c.bf16 %v216_v16, %v215_v15  ;;  %v249_v20 = vpack.c.bf16 %v230_v18, %v229_v17  ;;  %v213_v21 = vld [vmem:[#allocation5 + $0x40] sm:$0xff]  ;;  %v214_v22 = vld [vmem:[#allocation5 + $0x48] sm:$0xff]  ;;  %v227_v23 = vld [vmem:[#allocation5 + $0xb0] sm:$0xff]  ;;  %s684_s28 = sshll.u32 %s756_s13, 4  ;;  %s685_s28 = int_to_ptr.vmem [resolvable:$false] %s684_s28 }
  0x4f   : > { %v228_v24 = vld [vmem:[#allocation5 + $0xb8] sm:$0xff]  ;;  %v182_v25 = vld [vmem:[%s893_s24 + $0x8] sm:$0xff]  ;;  %v241_v29 = vpack.c.bf16 %v214_v22, %v213_v21  ;;  %v211_v33 = vld [vmem:[#allocation5 + $0x30] sm:$0xff]  ;;  %p682_p7 = pnand %p681_p3, %p996_p10  ;;  %s686_s3 = scalar_lea.vmem %s685_s28, 2048 }
  0x50   : > { %v184_v26 = vld [vmem:[%s893_s24 + $0x18] sm:$0xff]  ;;  %v190_v27 = vld [vmem:[%s893_s24 + $0x48] sm:$0xff]  ;;  %v248_v32 = vpack.c.bf16 %v228_v24, %v227_v23  ;;  %v225_v35 = vld [vmem:[#allocation5 + $0xa0] sm:$0xff]  ;;  %p687_p12 = scmp.lt.s32.totalorder %s936_s18, %s685_s28  ;;  %p688_p2 = scmp.lt.s32.totalorder %s686_s3, %s680_s27 }
  0x51   : > { %494 = vmatpush3.bf16.msra.mxu0 %v243_v13  ;;  %540 = vmatpush3.bf16.msra.mxu1 %v243_v13  ;;  %v192_v28 = vld [vmem:[%s893_s24 + $0x58] sm:$0xff]  ;;  %v198_v30 = vpack.c.bf16 %v184_v26, %v182_v25  ;;  %v226_v36 = vld [vmem:[#allocation5 + $0xa8] sm:$0xff]  ;;  %v209_v39 = vld [vmem:[#allocation5 + $0x20] sm:$0xff]  ;;  %p683_p11 = pneg %p682_p7 }
  0x52   : > { %495 = vmatprep.subr.bf16.mxu0 %v250_v14  ;;  %533 = vmatprep.subr.bf16.mxu1 %v250_v14  ;;  %v202_v31 = vpack.c.bf16 %v192_v28, %v190_v27  ;;  %v212_v34 = vld [vmem:[#allocation5 + $0x38] sm:$0xff]  ;;  %v247_v38 = vpack.c.bf16 %v226_v36, %v225_v35  ;;  %v210_v40 = vld [vmem:[#allocation5 + $0x28] sm:$0xff]  ;;  %v223_v41 = vld [vmem:[#allocation5 + $0x90] sm:$0xff]  ;;  %p689_p13 = por %p688_p2, %p687_p12 }
  0x53   : > { %285 = vmatprep.mubr.bf16.mxu0 %v198_v30  ;;  %v240_v37 = vpack.c.bf16 %v212_v34, %v211_v33  ;;  %v224_v42 = vld [vmem:[#allocation5 + $0x98] sm:$0xff]  ;;  %v239_v43 = vpack.c.bf16 %v210_v40, %v209_v39  ;;  %v207_v45 = vld [vmem:[#allocation5 + $0x10] sm:$0xff]  ;;  %v221_v47 = vld [vmem:[#allocation5 + $0x80] sm:$0xff] }
  0x54   : > { %301 = vmatprep.mubr.bf16.mxu1 %v202_v31  ;;  %v246_v44 = vpack.c.bf16 %v224_v42, %v223_v41  ;;  %v208_v46 = vld [vmem:[#allocation5 + $0x18] sm:$0xff]  ;;  %v222_v48 = vld [vmem:[#allocation5 + $0x88] sm:$0xff]  ;;  %v205_v51 = vld [vmem:[#allocation5] sm:$0xff]  ;;  %p690_p0 = pnand %p689_p13, %p683_p11 }
  0x55   : > { %496 = vmatpush3.bf16.msra.mxu0 %v242_v19  ;;  %541 = vmatpush3.bf16.msra.mxu1 %v242_v19  ;;  %v238_v49 = vpack.c.bf16 %v208_v46, %v207_v45  ;;  %v245_v50 = vpack.c.bf16 %v222_v48, %v221_v47  ;;  %v206_v52 = vld [vmem:[#allocation5 + $0x8] sm:$0xff]  ;;  %v181_v53 = vld [vmem:[%s893_s24] sm:$0xff]  ;;  %v183_v54 = vld [vmem:[%s893_s24 + $0x10] sm:$0xff] }
  0x56   : > { %497 = vmatprep.subr.bf16.mxu0 %v249_v20  ;;  %534 = vmatprep.subr.bf16.mxu1 %v249_v20  ;;  %v237_v55 = vpack.c.bf16 %v206_v52, %v205_v51  ;;  %v189_v56 = vld [vmem:[%s893_s24 + $0x40] sm:$0xff]  ;;  %v191_v57 = vld [vmem:[%s893_s24 + $0x50] sm:$0xff]  ;;  %v186_v58 = vld [vmem:[%s893_s24 + $0x28] sm:$0xff]  ;;  %v197_v62 = vpack.c.bf16 %v183_v54, %v181_v53 }
  0x57   : > { %v188_v59 = vld [vmem:[%s893_s24 + $0x38] sm:$0xff]  ;;  %v194_v60 = vld [vmem:[%s893_s24 + $0x68] sm:$0xff]  ;;  %v201_v63 = vpack.c.bf16 %v191_v57, %v189_v56  ;;  %v185_v2 = vld [vmem:[%s893_s24 + $0x20] sm:$0xff] }
  0x58   : > { %v196_v61 = vld [vmem:[%s893_s24 + $0x78] sm:$0xff]  ;;  %v200_v0 = vpack.c.bf16 %v188_v59, %v186_v58  ;;  %v187_v3 = vld [vmem:[%s893_s24 + $0x30] sm:$0xff]  ;;  %v193_v4 = vld [vmem:[%s893_s24 + $0x60] sm:$0xff] }
  0x59   : > { %498 = vmatpush3.bf16.msra.mxu0 %v241_v29  ;;  %542 = vmatpush3.bf16.msra.mxu1 %v241_v29  ;;  %v204_v1 = vpack.c.bf16 %v196_v61, %v194_v60  ;;  %v195_v5 = vld [vmem:[%s893_s24 + $0x70] sm:$0xff]  ;;  %v199_v6 = vpack.c.bf16 %v187_v3, %v185_v2 }
  0x5a   : > { %499 = vmatprep.subr.bf16.mxu0 %v248_v32  ;;  %535 = vmatprep.subr.bf16.mxu1 %v248_v32  ;;  %v203_v7 = vpack.c.bf16 %v195_v5, %v193_v4 }
  0x5d   : > { %500 = vmatpush3.bf16.msra.mxu0 %v240_v37  ;;  %543 = vmatpush3.bf16.msra.mxu1 %v240_v37 }
  0x5e   : > { %501 = vmatprep.subr.bf16.mxu0 %v247_v38  ;;  %536 = vmatprep.subr.bf16.mxu1 %v247_v38 }
  0x61   : > { %502 = vmatpush3.bf16.msra.mxu0 %v239_v43  ;;  %544 = vmatpush3.bf16.msra.mxu1 %v239_v43 }
  0x62   : > { %503 = vmatprep.subr.bf16.mxu0 %v246_v44  ;;  %537 = vmatprep.subr.bf16.mxu1 %v246_v44 }
  0x65   : > { %504 = vmatpush3.bf16.msra.mxu0 %v238_v49  ;;  %545 = vmatpush3.bf16.msra.mxu1 %v238_v49 }
  0x66   : > { %505 = vmatprep.subr.bf16.mxu0 %v245_v50  ;;  %538 = vmatprep.subr.bf16.mxu1 %v245_v50 }
  0x69   : > { %506 = vmatpush3.bf16.msra.mxu0 %v237_v55  ;;  %546 = vmatpush3.bf16.msra.mxu1 %v237_v55 }
  0x6c   : > { %286 = vmatmul.mubr.bf16.vlgmr.msra.gmra.mxu0 %v197_v62  ;;  %302 = vmatmul.mubr.bf16.vlgmr.msra.gmra.mxu1 %v201_v63 }
  0x6d   : > { %293 = vmatprep.mubr.bf16.mxu0 %v200_v0  ;;  %309 = vmatprep.mubr.bf16.mxu1 %v204_v1 }
  0x74   : > { %294 = vmatmul.mubr.bf16.gmra.mxu0 %v199_v6  ;;  %310 = vmatmul.mubr.bf16.gmra.mxu1 %v203_v7 }
 0x12c   : > { %v507_v8 = vpop.f32.mrf.mxu0  ;;  %v519_v9 = vpop.f32.mrf.mxu1 }
 0x12e   : > { %v508_v10 = vpop.f32.mrf.mxu0  ;;  %v520_v11 = vpop.f32.mrf.mxu1 }
 0x12f   : > { %v509_v12 = vadd.f32 %v508_v10, %v507_v8  ;;  %v919_v15 = vadd.f32 %v520_v11, %v519_v9 }
 0x130   : > { %v510_v13 = vpop.f32.mrf.mxu0  ;;  %v522_v14 = vpop.f32.mrf.mxu1 }
 0x131   : > { %v318_v16 = vmul.f32 %v509_v12, %v509_v12  ;;  %v322_v24 = vmul.f32 %v919_v15, %v919_v15 }
 0x132   : > { %v511_v17 = vpop.f32.mrf.mxu0  ;;  %v523_v18 = vpop.f32.mrf.mxu1 }
 0x133   : > { %v524_v19 = vadd.f32 %v523_v18, %v522_v14  ;;  %326 = vadd.xlane.f32.xlu0 %v318_v16  ;;  %v921_v22 = vadd.f32 %v511_v17, %v510_v13 }
 0x134   : > { %v513_v20 = vpop.f32.mrf.mxu0  ;;  %v525_v21 = vpop.f32.mrf.mxu1 }
 0x135   : > { %v323_v23 = vmul.f32 %v524_v19, %v524_v19  ;;  %v319_v32 = vmul.f32 %v921_v22, %v921_v22 }
 0x136   : > { %v514_v25 = vpop.f32.mrf.mxu0  ;;  %v526_v26 = vpop.f32.mrf.mxu1 }
 0x137   : > { %v515_v27 = vadd.f32 %v514_v25, %v513_v20  ;;  %336 = vadd.xlane.f32.xlu1 %v323_v23  ;;  %334 = vadd.xlane.f32.xlu0 %v322_v24  ;;  %v527_v30 = vadd.f32 %v526_v26, %v525_v21 }
 0x138   : > { %v516_v28 = vpop.f32.mrf.mxu0  ;;  %v528_v29 = vpop.f32.mrf.mxu1 }
 0x139   : > { %v320_v31 = vmul.f32 %v515_v27, %v515_v27  ;;  %v324_v38 = vmul.f32 %v527_v30, %v527_v30 }
 0x13a   : > { %v517_v33 = vpop.f32.mrf.mxu0  ;;  %v529_v34 = vpop.f32.mrf.mxu1 }
 0x13b   : > { %v518_v35 = vadd.f32 %v517_v33, %v516_v28  ;;  %330 = vadd.xlane.f32.xlu1 %v320_v31  ;;  %328 = vadd.xlane.f32.xlu0 %v319_v32  ;;  %v530_v36 = vadd.f32 %v529_v34, %v528_v29 }
 0x13d   : > { %v321_v37 = vmul.f32 %v518_v35, %v518_v35  ;;  %v325_v39 = vmul.f32 %v530_v36, %v530_v36 }
 0x13f   : > { %332 = vadd.xlane.f32.xlu1 %v321_v37  ;;  %338 = vadd.xlane.f32.xlu0 %v324_v38 }
 0x143   : > { %340 = vadd.xlane.f32.xlu1 %v325_v39 }
 0x1bc   : > { %v327_v40 = vpop.xlane.xlu0 %326 }
 0x1bd   : > { %v342_v41 = vmax.f32 %v327_v40, 1e-12 }
 0x1bf   : > { %610 = vrsqrt.f32 %v342_v41 }
 0x1c0   : > { %v337_v42 = vpop.xlane.xlu1 %336  ;;  %v335_v43 = vpop.xlane.xlu0 %334 }
 0x1c1   : > { %v347_v44 = vmax.f32 %v337_v42, 1e-12  ;;  %v346_v45 = vmax.f32 %v335_v43, 1e-12 }
 0x1c3   : > { %612 = vrsqrt.f32 %v347_v44 }
 0x1c4   : > { %614 = vrsqrt.f32 %v346_v45  ;;  %v331_v46 = vpop.xlane.xlu1 %330  ;;  %v329_v47 = vpop.xlane.xlu0 %328 }
 0x1c5   : > { %v344_v48 = vmax.f32 %v331_v46, 1e-12  ;;  %v343_v49 = vmax.f32 %v329_v47, 1e-12 }
 0x1c7   : > { %616 = vrsqrt.f32 %v344_v48 }
 0x1c8   : > { %618 = vrsqrt.f32 %v343_v49  ;;  %v333_v50 = vpop.xlane.xlu1 %332  ;;  %v339_v51 = vpop.xlane.xlu0 %338 }
 0x1c9   : > { %v345_v52 = vmax.f32 %v333_v50, 1e-12  ;;  %v348_v53 = vmax.f32 %v339_v51, 1e-12 }
 0x1cb   : > { %620 = vrsqrt.f32 %v345_v52 }
 0x1cc   : > { %v611_v54 = vpop.eup %610  ;;  %622 = vrsqrt.f32 %v348_v53  ;;  %v341_v55 = vpop.xlane.xlu1 %340 }
 0x1cd   : > { %v358_v56 = vmul.f32 %v611_v54, %v509_v12  ;;  %v349_v57 = vmax.f32 %v341_v55, 1e-12 }
 0x1cf   : > { %366 = vst [vmem:[%s177_s17] sm:$0xff] %v358_v56  ;;  %624 = vrsqrt.f32 %v349_v57 }
 0x1d0   : > { %v613_v58 = vpop.eup %612 }
 0x1d1   : > { %v615_v59 = vpop.eup %614  ;;  %v363_v60 = vmul.f32 %v613_v58, %v524_v19 }
 0x1d2   : > { %v362_v61 = vmul.f32 %v615_v59, %v919_v15 }
 0x1d3   : > { %371 = vst [vmem:[%s177_s17 + $0x28] sm:$0xff] %v363_v60 }
 0x1d4   : > { %v617_v62 = vpop.eup %616  ;;  %370 = vst [vmem:[%s177_s17 + $0x20] sm:$0xff] %v362_v61 }
 0x1d5   : > { %v619_v63 = vpop.eup %618  ;;  %v360_v0 = vmul.f32 %v617_v62, %v515_v27 }
 0x1d6   : > { %v359_v1 = vmul.f32 %v619_v63, %v921_v22 }
 0x1d7   : > { %368 = vst [vmem:[%s177_s17 + $0x10] sm:$0xff] %v360_v0 }
 0x1d8   : > { %v621_v2 = vpop.eup %620  ;;  %367 = vst [vmem:[%s177_s17 + $0x8] sm:$0xff] %v359_v1 }
 0x1d9   : > { %v623_v3 = vpop.eup %622  ;;  %v361_v4 = vmul.f32 %v621_v2, %v518_v35 }
 0x1da   : > { %v364_v5 = vmul.f32 %v623_v3, %v527_v30 }
 0x1db   : > { %369 = vst [vmem:[%s177_s17 + $0x18] sm:$0xff] %v361_v4 }
 0x1dc   : > { %v625_v6 = vpop.eup %624  ;;  %372 = vst [vmem:[%s177_s17 + $0x30] sm:$0xff] %v364_v5 }
 0x1dd   : > { %v365_v7 = vmul.f32 %v625_v6, %v530_v36 }
 0x1df   : > { %373 = vst [vmem:[%s177_s17 + $0x38] sm:$0xff] %v365_v7 }
 0x1e0   : > { %693 = shalt.err (!%p690_p0)
}
 0x1e1   : > { %s694_s4 = scalar_lea.hbm %s934_s25, 1024  ;;  %s698_s7 = scalar_lea.hbm %s980_s2, 4096 }
 0x1e2   : > { %p695_p5 = scmp.ne.s32.totalorder %s934_s25, %s694_s4  ;;  %p699_p4 = scmp.lt.s32.totalorder %s934_s25, %s980_s2 }
 0x1e3   : > { %p700_p6 = scmp.lt.s32.totalorder %s698_s7, %s694_s4 }
 0x1e4   : > { %p696_p9 = pnand %p695_p5, %p996_p10 }
 0x1e5   : > { %p701_p8 = por %p700_p6, %p699_p4 }
 0x1e6   : > { %p697_p1 = pneg %p696_p9 }
 0x1e8   : > { %p702_p3 = pnand %p701_p8, %p697_p1 }
 0x1ea   : > { %705 = shalt.err (!%p702_p3)
}
 0x1eb   : > { %s757_s24 = smov 128   ;;  %s758_s15 = smov 8  }
 0x1ec   : > { %553 = dma.vmem_to_hbm [thread:$0]  (%p996_p10), %s936_s18, 1024, %s934_s25, %s375_s26, %s757_s24, %s757_s24, %s758_s15  }
 0x1ed PF: > { %p570_p7 = scmp.ge.s32.totalorder %s748_s12, 2  ;;  %s403_s17 = sand.u32 1, %s736_s9  }
 0x1ee   : > { %p997_p11 = scmp.ne.s32.totalorder %s986_s16, 0  ;;  %s404_s8 = scalar_lea.sflag [#allocation4], %s403_s17 }
 0x1f0   : > { %p564_p12 = pnand %p570_p7, %p997_p11 }
 0x1f2   : > { %p565_p2 = pneg %p564_p12 }
 0x1f4   : > { %731 = dma.done.wait (%p565_p2), %s404_s8, 1024  }
 0x1f5   : > { %733 = vsyncadd (%p565_p2), %s404_s8, 4294966272  ;;  %p16_p13 = scmp.ge.s32.totalorder %s827_s21, 6   ;;  %s998_s9 = smov %s740_s10 }
 0x1f6   : > { %s999_s10 = smov %s744_s11  ;;  %s1000_s11 = smov %s844_s29 }
 0x1f7   : > { %s1001_s12 = smov %s827_s21  ;;  %18 = sbr.rel (!%p16_p13) target bundleno = 6 (0x6), region = 77 }
 0x1fc   :  { %409 = vsyncpa [#allocation3], 1 }
 0x1fd   :  { %411 = vsyncpa [#allocation3 + $0x1], 1 }
 0x1fe   :  { %412 = vsyncpa [#allocation6], 1 }
 0x1ff   :  { %413 = vsyncpa [#allocation4], 1 }
 0x200   :  { %415 = vsyncpa [#allocation4 + $0x1], 1 }

</bundles_post_ra>
